<compile_context>
chip_gen: v7x
topology: tpu7x:2x2x1
jax: 0.10.0
libtpu: 0.0.40
codegen_flags: <defaults>
</compile_context>

<pallas_src>
import jax
import jax.numpy as jnp
from jax.experimental import pallas as pl
from jax.experimental.pallas import tpu as pltpu


def _bifpn_add3_kernel(w_ref, x0_ref, x1_ref, x2_ref, cw_ref, cb_ref, o_ref):
    # w_ref: (3,) pre-normalized fusion weights in SMEM.
    w0 = w_ref[0]
    w1 = w_ref[1]
    w2 = w_ref[2]

    # Tiles are (1, C1, t_hw); drop the leading batch dim -> (C1, t_hw).
    x0 = x0_ref[0].astype(jnp.float32)
    x1 = x1_ref[0].astype(jnp.float32)
    x2 = x2_ref[0].astype(jnp.float32)

    fused = w0 * x0 + w1 * x1 + w2 * x2
    act = fused * jax.nn.sigmoid(fused)                       # SiLU, (C1, t_hw)

    # 1x1 conv over channels: (C2, C1) @ (C1, t_hw) -> (C2, t_hw).
    # MXU operand dtype follows the conv-weight dtype (f32 or bf16); the
    # accumulation is always f32.
    out = jnp.dot(cw_ref[...], act.astype(cw_ref.dtype),
                  preferred_element_type=jnp.float32)
    out = out + cb_ref[...]                                   # (C2, 1) broadcast
    o_ref[0] = out.astype(o_ref.dtype)                        # lane-dense store


def _round_up(x, m):
    return -(-x // m) * m


def _vmem_capacity_bytes():
    """Per-core VMEM capacity; conservative (v7x) fallback if the query fails."""
    try:
        cap = int(pltpu.get_tpu_info().vmem_capacity_bytes)
        if cap > 0:
            return cap
    except Exception:
        pass
    return 64 << 20


def _choose_lane_tile(hw, c1, c2, in_itemsize, out_itemsize, n_batch,
                      max_tile, vmem_budget):
    """Pick the lane-tile width t_hw (multiple of 128 unless it spans all of HW)."""
    # Bytes per lane column: double-buffered input/output streams plus the f32
    # temporaries Mosaic materializes (x0/x1/x2 upcasts, fused, act, f32 out).
    per_lane = (2 * (3 * c1 * in_itemsize + c2 * out_itemsize)
                + (5 * c1 + c2) * 4)
    cap = max(128, (vmem_budget // per_lane) // 128 * 128)
    limit = max(128, min(max_tile, cap))

    if hw <= limit:
        t = hw                              # full-extent block: exact, no padding
    else:
        # Prefer an exact multiple-of-128 divisor of hw -> no partial edge block.
        t = 0
        cand = limit
        while cand >= 128:
            if hw % cand == 0:
                t = cand
                break
            cand -= 128
        if t == 0:
            t = limit                       # tail handled as a masked partial block

    # Megacore (v7x, 2 TCs): with a single batch make sure the grid has >= 2 steps.
    if n_batch == 1 and hw > 128 and pl.cdiv(hw, t) < 2:
        t = max(128, _round_up(-(-hw // 2), 128))
    return t


def bifpn_add3(x0, x1, x2, w, conv_weight, conv_bias, *,
               out_dtype=None, mxu_dtype=None, max_tile=2048):
    """x0,x1,x2: (N, C1, H, W). conv_weight: (C2, C1, 1, 1). conv_bias: (C2,).

    out_dtype: output storage dtype (default: same as inputs; bf16 halves the
               writeback stream).
    mxu_dtype: matmul operand dtype (default f32; bf16 is single-MXU-pass).
    """
    N, C1, H, W = x0.shape
    C2 = conv_weight.shape[0]
    HW = H * W
    in_dtype = jnp.dtype(x0.dtype)
    out_dtype = jnp.dtype(out_dtype) if out_dtype is not None else in_dtype
    mxu_dtype = jnp.dtype(mxu_dtype) if mxu_dtype is not None else jnp.dtype(jnp.float32)

    vmem_cap = _vmem_capacity_bytes()
    # ~35 MiB budget on v7x (64 MiB/TC), up to 64 MiB on v5e/v6e (128 MiB).
    vmem_budget = min(64 << 20, int(vmem_cap * 0.55))

    t_hw = _choose_lane_tile(HW, C1, C2, in_dtype.itemsize, out_dtype.itemsize,
                             N, max_tile, vmem_budget)

    # NCHW -> (N, C1, HW): contiguous reshape, no pad / transpose / cast passes.
    f0 = x0.reshape(N, C1, HW)
    f1 = x1.reshape(N, C1, HW)
    f2 = x2.reshape(N, C1, HW)

    # Normalize fusion weights once (outside the per-tile body).
    w_norm = (w / (jnp.sum(w) + 1e-4)).astype(jnp.float32)
    cw = conv_weight.reshape(C2, C1).astype(mxu_dtype)        # left-multiply weight
    cb = conv_bias.reshape(C2, 1).astype(jnp.float32)         # lane-broadcast bias

    grid = (N, pl.cdiv(HW, t_hw))

    vmem_needed = (2 * (3 * C1 * in_dtype.itemsize + C2 * out_dtype.itemsize) * t_hw
                   + (5 * C1 + C2) * 4 * t_hw
                   + mxu_dtype.itemsize * C1 * C2 + 4 * C2)
    vmem_limit = int(min(int(vmem_cap * 0.75),
                         max(vmem_needed + (4 << 20), 16 << 20)))

    cost = pl.CostEstimate(
        flops=int(2 * N * HW * C1 * C2 + 7 * N * HW * C1),
        transcendentals=int(N * HW * C1),
        bytes_accessed=int(N * HW * (3 * C1 * in_dtype.itemsize
                                     + C2 * out_dtype.itemsize)
                           + mxu_dtype.itemsize * C1 * C2 + 4 * (C2 + 3)),
    )

    out = pl.pallas_call(
        _bifpn_add3_kernel,
        out_shape=jax.ShapeDtypeStruct((N, C2, HW), out_dtype),
        grid_spec=pltpu.PrefetchScalarGridSpec(
            num_scalar_prefetch=0,
            grid=grid,
            in_specs=[
                pl.BlockSpec(memory_space=pltpu.SMEM),                  # w_norm (3,)
                pl.BlockSpec((1, C1, t_hw), lambda n, j: (n, 0, j)),    # x0 tile
                pl.BlockSpec((1, C1, t_hw), lambda n, j: (n, 0, j)),    # x1 tile
                pl.BlockSpec((1, C1, t_hw), lambda n, j: (n, 0, j)),    # x2 tile
                pl.BlockSpec((C2, C1), lambda n, j: (0, 0)),            # conv weight
                pl.BlockSpec((C2, 1), lambda n, j: (0, 0)),             # conv bias
            ],
            out_specs=pl.BlockSpec((1, C2, t_hw), lambda n, j: (n, 0, j)),
        ),
        compiler_params=pltpu.CompilerParams(
            dimension_semantics=("parallel", "parallel"),
            vmem_limit_bytes=vmem_limit,
        ),
        cost_estimate=cost,
    )(w_norm, f0, f1, f2, cw, cb)

    return out.reshape(N, C2, H, W)


def bifpn_add3_ref(x0, x1, x2, w, conv_weight, conv_bias):
    """Pure-JAX reference matching the PyTorch forward."""
    weight = w / (jnp.sum(w) + 1e-4)
    fused = weight[0] * x0 + weight[1] * x1 + weight[2] * x2
    act = fused * jax.nn.sigmoid(fused)
    y = jnp.einsum("nchw,oc->nohw", act,
                   conv_weight.reshape(conv_weight.shape[0], -1))
    return y + conv_bias[None, :, None, None]


if __name__ == "__main__":
    key = jax.random.PRNGKey(0)
    k0, k1, k2, kw, kb = jax.random.split(key, 5)

    # --- Case 1: N=2, C1=C2=4, 16x16 (exact single-tile path, f32 end-to-end).
    N, C1, C2, H, W = 2, 4, 4, 16, 16
    x0 = jax.random.normal(k0, (N, C1, H, W), dtype=jnp.float32)
    x1 = jax.random.normal(k1, (N, C1, H, W), dtype=jnp.float32)
    x2 = jax.random.normal(k2, (N, C1, H, W), dtype=jnp.float32)
    w = jnp.ones((3,), dtype=jnp.float32)
    conv_weight = 0.1 * jax.random.normal(kw, (C2, C1, 1, 1), dtype=jnp.float32)
    conv_bias = 0.1 * jax.random.normal(kb, (C2,), dtype=jnp.float32)

    ref = bifpn_add3_ref(x0, x1, x2, w, conv_weight, conv_bias)
    out = jax.block_until_ready(bifpn_add3(x0, x1, x2, w, conv_weight, conv_bias))
    assert out.shape == (N, C2, H, W)
    assert jnp.allclose(out, ref, atol=1e-5, rtol=1e-5), "f32 mismatch vs reference"

    # --- Case 2: N=1, C=8, 20x20 -> forces a 2-step grid (megacore) and a
    # masked partial edge block (HW=400 split into 256 + 144 lanes).
    N2, C, H2, W2 = 1, 8, 20, 20
    kk = jax.random.split(jax.random.PRNGKey(1), 5)
    y0 = jax.random.normal(kk[0], (N2, C, H2, W2), dtype=jnp.float32)
    y1 = jax.random.normal(kk[1], (N2, C, H2, W2), dtype=jnp.float32)
    y2 = jax.random.normal(kk[2], (N2, C, H2, W2), dtype=jnp.float32)
    w2 = jnp.array([0.5, 1.0, 1.5], dtype=jnp.float32)
    cw2 = 0.1 * jax.random.normal(kk[3], (C, C, 1, 1), dtype=jnp.float32)
    cb2 = 0.1 * jax.random.normal(kk[4], (C,), dtype=jnp.float32)

    ref2 = bifpn_add3_ref(y0, y1, y2, w2, cw2, cb2)
    out2 = jax.block_until_ready(bifpn_add3(y0, y1, y2, w2, cw2, cb2))
    assert out2.shape == (N2, C, H2, W2)
    assert jnp.allclose(out2, ref2, atol=1e-5, rtol=1e-5), \
        "partial-block path mismatch vs reference"

    # --- Case 3: bf16 output + bf16 MXU operands (inputs stay native f32 in HBM;
    # only the writeback stream is halved). Numerics within bf16 tolerance.
    out_bf16 = jax.block_until_ready(
        bifpn_add3(x0, x1, x2, w, conv_weight, conv_bias,
                   out_dtype=jnp.bfloat16, mxu_dtype=jnp.bfloat16))
    assert jnp.allclose(out_bf16.astype(jnp.float32), ref, atol=5e-2, rtol=5e-2), \
        "bf16 output path mismatch vs reference"

    print("KERNEL_OK")
</pallas_src>

<mosaic_0001>
module attributes {stable_mosaic.version = 11 : i64} {
  func.func @_bifpn_add3_kernel(%arg0: i32, %arg1: i32, %arg2: memref<3xf32, #tpu.memory_space<smem>>, %arg3: memref<1x4x256xf32, #tpu.memory_space<vmem>>, %arg4: memref<1x4x256xf32, #tpu.memory_space<vmem>>, %arg5: memref<1x4x256xf32, #tpu.memory_space<vmem>>, %arg6: memref<4x4xf32, #tpu.memory_space<vmem>>, %arg7: memref<4x1xf32, #tpu.memory_space<vmem>>, %arg8: memref<1x4x256xf32, #tpu.memory_space<vmem>>) attributes {dimension_semantics = [#tpu.dimension_semantics<parallel>, #tpu.dimension_semantics<parallel>], iteration_bounds = array<i64: 2, 1>, scalar_prefetch = 0 : i64, scratch_operands = 0 : i64, tpu.core_type = #tpu.core_type<tc>, window_params = [{transform_indices = @transform_0, window_bounds = array<i64: 3>}, {transform_indices = @transform_1, window_bounds = array<i64: 1, 4, 256>}, {transform_indices = @transform_2, window_bounds = array<i64: 1, 4, 256>}, {transform_indices = @transform_3, window_bounds = array<i64: 1, 4, 256>}, {pipeline_mode = #tpu.pipeline_mode<synchronous>, transform_indices = @transform_4, window_bounds = array<i64: 4, 4>}, {pipeline_mode = #tpu.pipeline_mode<synchronous>, transform_indices = @transform_5, window_bounds = array<i64: 4, 1>}, {transform_indices = @transform_6, window_bounds = array<i64: 1, 4, 256>}]} {
    %c0 = arith.constant 0 : index
    %0 = memref.load %arg2[%c0] : memref<3xf32, #tpu.memory_space<smem>>
    %c1 = arith.constant 1 : index
    %1 = memref.load %arg2[%c1] : memref<3xf32, #tpu.memory_space<smem>>
    %c2 = arith.constant 2 : index
    %2 = memref.load %arg2[%c2] : memref<3xf32, #tpu.memory_space<smem>>
    %c0_0 = arith.constant 0 : index
    %c0_1 = arith.constant 0 : index
    %c0_2 = arith.constant 0 : index
    %3 = vector.load %arg3[%c0_0, %c0_1, %c0_2] : memref<1x4x256xf32, #tpu.memory_space<vmem>>, vector<1x4x256xf32>
    %4 = vector.shape_cast %3 : vector<1x4x256xf32> to vector<4x256xf32>
    %c0_3 = arith.constant 0 : index
    %c0_4 = arith.constant 0 : index
    %c0_5 = arith.constant 0 : index
    %5 = vector.load %arg4[%c0_3, %c0_4, %c0_5] : memref<1x4x256xf32, #tpu.memory_space<vmem>>, vector<1x4x256xf32>
    %6 = vector.shape_cast %5 : vector<1x4x256xf32> to vector<4x256xf32>
    %c0_6 = arith.constant 0 : index
    %c0_7 = arith.constant 0 : index
    %c0_8 = arith.constant 0 : index
    %7 = vector.load %arg5[%c0_6, %c0_7, %c0_8] : memref<1x4x256xf32, #tpu.memory_space<vmem>>, vector<1x4x256xf32>
    %8 = vector.shape_cast %7 : vector<1x4x256xf32> to vector<4x256xf32>
    %9 = vector.broadcast %0 : f32 to vector<4x256xf32>
    %10 = arith.mulf %9, %4 : vector<4x256xf32>
    %11 = vector.broadcast %1 : f32 to vector<4x256xf32>
    %12 = arith.mulf %11, %6 : vector<4x256xf32>
    %13 = arith.addf %10, %12 : vector<4x256xf32>
    %14 = vector.broadcast %2 : f32 to vector<4x256xf32>
    %15 = arith.mulf %14, %8 : vector<4x256xf32>
    %16 = arith.addf %13, %15 : vector<4x256xf32>
    %17 = arith.negf %16 : vector<4x256xf32>
    %18 = math.exp %17 : vector<4x256xf32>
    %cst = arith.constant 1.000000e+00 : f32
    %19 = vector.broadcast %cst : f32 to vector<4x256xf32>
    %20 = arith.addf %19, %18 : vector<4x256xf32>
    %21 = arith.divf %19, %20 : vector<4x256xf32>
    %22 = arith.mulf %16, %21 : vector<4x256xf32>
    %c0_9 = arith.constant 0 : index
    %c0_10 = arith.constant 0 : index
    %23 = vector.load %arg6[%c0_9, %c0_10] : memref<4x4xf32, #tpu.memory_space<vmem>>, vector<4x4xf32>
    %cst_11 = arith.constant dense<0.000000e+00> : vector<4x256xf32>
    %24 = tpu.matmul %23, %22, %cst_11 {dimension_numbers = #tpu.dot_dimension_numbers<[1], [0], [0], [1], [0, 0, 1, 1], [], []>} : vector<4x4xf32>, vector<4x256xf32>, vector<4x256xf32> -> vector<4x256xf32>
    %c0_12 = arith.constant 0 : index
    %c0_13 = arith.constant 0 : index
    %25 = vector.load %arg7[%c0_12, %c0_13] : memref<4x1xf32, #tpu.memory_space<vmem>>, vector<4x1xf32>
    %26 = vector.broadcast %25 : vector<4x1xf32> to vector<4x256xf32>
    %27 = arith.addf %24, %26 : vector<4x256xf32>
    %c0_14 = arith.constant 0 : index
    %c0_15 = arith.constant 0 : index
    %c0_16 = arith.constant 0 : index
    %28 = vector.load %arg8[%c0_14, %c0_15, %c0_16] : memref<1x4x256xf32, #tpu.memory_space<vmem>>, vector<1x4x256xf32>
    %29 = vector.shape_cast %28 : vector<1x4x256xf32> to vector<4x256xf32>
    %30 = vector.shape_cast %27 : vector<4x256xf32> to vector<1x4x256xf32>
    tpu.vector_store %arg8[%c0_14, %c0_15, %c0_16], %30 {strides = array<i32>} : memref<1x4x256xf32, #tpu.memory_space<vmem>>, vector<1x4x256xf32>,
    return
  }
  func.func @transform_0(%arg0: i32, %arg1: i32) -> i32 {
    %c0_i32 = arith.constant 0 : i32
    %c0_i32_0 = arith.constant 0 : i32
    return %c0_i32 : i32
  }
  func.func @transform_1(%arg0: i32, %arg1: i32) -> (i32, i32, i32) {
    %c0_i32 = arith.constant 0 : i32
    %c0_i32_0 = arith.constant 0 : i32
    return %arg0, %c0_i32, %arg1 : i32, i32, i32
  }
  func.func @transform_2(%arg0: i32, %arg1: i32) -> (i32, i32, i32) {
    %c0_i32 = arith.constant 0 : i32
    %c0_i32_0 = arith.constant 0 : i32
    return %arg0, %c0_i32, %arg1 : i32, i32, i32
  }
  func.func @transform_3(%arg0: i32, %arg1: i32) -> (i32, i32, i32) {
    %c0_i32 = arith.constant 0 : i32
    %c0_i32_0 = arith.constant 0 : i32
    return %arg0, %c0_i32, %arg1 : i32, i32, i32
  }
  func.func @transform_4(%arg0: i32, %arg1: i32) -> (i32, i32) {
    %c0_i32 = arith.constant 0 : i32
    %c0_i32_0 = arith.constant 0 : i32
    %c0_i32_1 = arith.constant 0 : i32
    return %c0_i32, %c0_i32_0 : i32, i32
  }
  func.func @transform_5(%arg0: i32, %arg1: i32) -> (i32, i32) {
    %c0_i32 = arith.constant 0 : i32
    %c0_i32_0 = arith.constant 0 : i32
    %c0_i32_1 = arith.constant 0 : i32
    return %c0_i32, %c0_i32_0 : i32, i32
  }
  func.func @transform_6(%arg0: i32, %arg1: i32) -> (i32, i32, i32) {
    %c0_i32 = arith.constant 0 : i32
    %c0_i32_0 = arith.constant 0 : i32
    return %arg0, %c0_i32, %arg1 : i32, i32, i32
  }
}

</mosaic_0001>

<bundles_post_ra>
// kernel: tpu_custom_call.1
= control target key start
LH: loop header
LB: loop body
LE: loop exit
PB: predicated region body
PF: predicated region fallthrough
CT: control target
= control target key end

     0   :  { %s1251_s0 = inlined_call_operand.hbm [shape: f32[3], index: 0, kind: input, shape index: {}]   ;;  %s1252_s1 = inlined_call_operand.hbm [shape: f32[2,4,256], index: 1, kind: input, shape index: {}]   ;;  %s1253_s2 = inlined_call_operand.hbm [shape: f32[2,4,256], index: 2, kind: input, shape index: {}]   ;;  %s1254_s3 = inlined_call_operand.vmem [shape: f32[2,4,256], index: 3, kind: input, shape index: {}]   ;;  %s1255_s4 = inlined_call_operand.vmem [shape: f32[4,4], index: 4, kind: input, shape index: {}]   ;;  %s1256_s5 = inlined_call_operand.vmem [shape: f32[4,1], index: 5, kind: input, shape index: {}]   ;;  %s1257_s6 = inlined_call_operand.hbm [shape: f32[2,4,256], index: 6, kind: output, shape index: {}]  }
   0x1   :  { %1267 = sst [smem:[#allocation17_spill]] %s1251_s0 }
   0x2   :  { %1268 = sst [smem:[#allocation18_spill]] %s1252_s1 }
   0x3   :  { %11 = vsyncpa [#allocation5], 0 }
   0x4   :  { %12 = vsyncpa [#allocation3], 0 }
   0x5   :  { %14 = vsyncpa [#allocation3 + $0x1], 0 }
   0x6   :  { %15 = vsyncpa [#allocation8], 0 }
   0x7   :  { %17 = vsyncpa [#allocation8 + $0x1], 0 }
   0x8   :  { %18 = vsyncpa [#allocation4], 0 }
   0x9   :  { %20 = vsyncpa [#allocation4 + $0x1], 0  ;;  %s975_s21 = smov 0   ;;  %s977_s22 = smov 0  }
   0xa   :  { %s979_s23 = smov 0   ;;  %s981_s24 = smov 0  }
   0xb   :  { %s983_s25 = smov 0   ;;  %s985_s26 = smov 0  }
   0xc LB: > { %1269 = sst [smem:[#allocation14_spill]] %s912_s21  ;;  %s651_s27 = sadd.s32 4294967295, %s932_s26   ;;  %s932_s26 = sphi %s985_s26, %s26_s26   ;;  %s928_s25 = sphi %s983_s25, %s1297_s25   ;;  %s924_s24 = sphi %s981_s24, %s1296_s24   ;;  %s920_s23 = sphi %s979_s23, %s1295_s23   ;;  %s916_s22 = sphi %s977_s22, %s1294_s22   ;;  %s912_s21 = sphi %s975_s21, %s1293_s21  }
   0xd   : > { %s652_s28 = sadd.s32 4294967294, %s932_s26   ;;  %p75_p0 = scmp.ne.s32.totalorder %s920_s23, %s916_s22 }
   0xe   : > { %p81_p1 = scmp.ne.s32.totalorder %s916_s22, %s912_s21  ;;  %p1011_p2 = scmp.eq.s32.totalorder %s651_s27, 0 }
   0xf   : > { %p205_p3 = scmp.eq.s32.totalorder %s651_s27, 1  ;;  %p211_p4 = scmp.eq.s32.totalorder %s652_s28, 1 }
  0x10   : > { %s1270_s29 = scalar_select %p1011_p2, 1, 0 }
  0x11   : > { %p653_p5 = scmp.ge.s32.totalorder %s932_s26, 1  ;;  %p1018_p6 = por %p1011_p2, %p81_p1 }
  0x12   : > { %p1025_p7 = por %p205_p3, %p75_p0  ;;  %p1029_p8 = por %p211_p4, %p81_p1 }
  0x13   : > { %s1271_s30 = scalar_select %p1018_p6, 1, 0 }
  0x14   : > { %s1272_s7 = scalar_select %p1025_p7, 1, 0 }
  0x15   : > { %s1273_s8 = scalar_select %p1029_p8, 1, 0 }
  0x16   : > { %p218_p9 = scmp.lt.s32.totalorder %s932_s26, 3  ;;  %s68_s10 = sadd.s32 1, %s920_s23 }
  0x17   : > { %1274 = sst [smem:[#allocation15_spill]] %s1273_s8  ;;  %s38_s11 = sadd.s32 1, %s928_s25 }
  0x18   : > { %p1034_p10 = pnand %p653_p5, %p218_p9  ;;  %p76_p13 = scmp.eq.s32.totalorder %s932_s26, 0 }
  0x19   : > { %p1050_p1 = scmp.ge.s32.totalorder %s38_s11, 2  ;;  %p710_p5 = scmp.lt.s32.totalorder %s932_s26, 2 }
  0x1a   : > { %s1275_s9 = scalar_select %p1034_p10, 1, 0 }
  0x1b   : > { %p694_p12 = pneg %p1034_p10  ;;  %p1057_p4 = por %p76_p13, %p75_p0 }
  0x1c   : > { %s1063_s15 = sand.u32 1, %s920_s23   ;;  %s1279_s0 = sld [smem:[#allocation17_spill]] }
  0x1d   : > { %p1046_p3 = pnand %p694_p12, %p1011_p2 }
  0x1f   : > { %p771_p12 = pneg %p1046_p3 }
  0x22   : > { %s769_s18 = scalar_lea.hbm %s1279_s0, 16 }
  0x23   : > { %p770_p9 = scmp.ne.s32.totalorder %s1279_s0, %s769_s18  ;;  %p776_p0 = scmp.lt.u32.totalorder %s769_s18, %s1279_s0 }
  0x25   : > { %p772_p11 = pnand %p771_p12, %p770_p9 }
  0x27   : > { %p773_p8 = pneg %p772_p11 }
  0x29   : > { %p778_p13 = pnand %p776_p0, %p773_p8 }
  0x2b   : > { %781 = shalt.err (!%p778_p13)
}
  0x2c   : > { %s934_s8 = smov [#allocation2]   ;;  %s1299_s11 = smov (%p1050_p1, %s38_s11), 0 }
  0x2d   : > { %697 = dma.hbm_to_smem (!%p1046_p3), %s1279_s0, 16, %s934_s8, [#allocation5]  }
  0x2e   : > { %1280 = sst [smem:[#allocation16_spill]] %s1299_s11  ;;  %s1260_s17 = sshll.u32 %s1063_s15, 3 }
  0x2f   : > { %s63_s18 = ssub.s32 %s928_s25, %s1299_s11  ;;  %s680_s12 = sshll.u32 %s928_s25, 7 }
  0x30   : > { %p66_p8 = scmp.eq.s32.totalorder %s63_s18, 0  ;;  %s1281_s1 = sld [smem:[#allocation18_spill]] }
  0x31   : > { %s250_s27 = scalar_lea.vmem [#allocation6], %s1260_s17  ;;  %p1105_p11 = pnand %p710_p5, %p1057_p4 }
  0x32   : > { %s260_s8 = sshll.u32 %s250_s27, 4  ;;  %s1112_s19 = scalar_lea.hbm %s1253_s2, %s680_s12  ;;  %s1099_s8 = int_to_ptr.vmem [resolvable:$true] %s260_s8 }
  0x33   : > { %s1097_s13 = scalar_select %p66_p8, %s920_s23, %s68_s10  }
  0x34   : > { %s247_s21 = scalar_lea.sflag [#allocation3], %s1063_s15  ;;  %p784_p1 = pneg %p1105_p11 }
  0x36   : > { %s1092_s20 = scalar_lea.hbm %s1281_s1, %s680_s12  ;;  %s787_s27 = scalar_lea.hbm %s1281_s1, 256 }
  0x37   : > { %s782_s17 = scalar_lea.hbm %s1092_s20, 128  ;;  %p788_p4 = scmp.lt.u32.totalorder %s1092_s20, %s1281_s1 }
  0x38   : > { %p783_p3 = scmp.ne.s32.totalorder %s1092_s20, %s782_s17  ;;  %p789_p5 = scmp.lt.u32.totalorder %s787_s27, %s782_s17 }
  0x39   : > { %p791_p13 = scmp.lt.u32.totalorder %s782_s17, %s1092_s20 }
  0x3a   : > { %p785_p9 = pnand %p784_p1, %p783_p3  ;;  %p790_p0 = por %p789_p5, %p788_p4 }
  0x3c   : > { %p786_p12 = pneg %p785_p9  ;;  %p792_p8 = por %p791_p13, %p790_p0 }
  0x3e   : > { %p793_p7 = pnand %p792_p8, %p786_p12 }
  0x40   : > { %796 = shalt.err (!%p793_p7)
}
  0x41   : > { %s797_s12 = scalar_lea.vmem %s1099_s8, 128  ;;  %s935_s16 = smov [#allocation6]  }
  0x42   : > { %p798_p3 = scmp.ne.s32.totalorder %s1099_s8, %s797_s12  ;;  %s802_s18 = sshll.u32 %s935_s16, 4  ;;  %s803_s18 = int_to_ptr.vmem [resolvable:$false] %s802_s18 }
  0x43   : > { %s804_s0 = scalar_lea.vmem %s803_s18, 256  ;;  %p805_p2 = scmp.lt.s32.totalorder %s1099_s8, %s803_s18 }
  0x44   : > { %p800_p9 = pnand %p798_p3, %p784_p1  ;;  %p806_p4 = scmp.lt.s32.totalorder %s804_s0, %s797_s12 }
  0x46   : > { %p801_p6 = pneg %p800_p9  ;;  %p807_p5 = por %p806_p4, %p805_p2 }
  0x48   : > { %p808_p0 = pnand %p807_p5, %p801_p6 }
  0x4a   : > { %811 = shalt.err (!%p808_p0)
}
  0x4b   : > { %701 = dma.hbm_to_vmem [thread:$0]  (!%p1105_p11), %s1092_s20, 128, %s1099_s8, %s247_s21  }
  0x4c   : > { %s1283_s11 = sshll.u32 %s1063_s15, 3  ;;  %s268_s14 = scalar_lea.sflag [#allocation8], %s1063_s15 }
  0x4d   : > { %s271_s17 = scalar_lea.vmem [#allocation7], %s1283_s11  ;;  %s812_s27 = scalar_lea.hbm %s1112_s19, 128 }
  0x4e   : > { %s281_s10 = sshll.u32 %s271_s17, 4  ;;  %p813_p2 = scmp.ne.s32.totalorder %s1112_s19, %s812_s27  ;;  %s282_s10 = int_to_ptr.vmem [resolvable:$true] %s281_s10 }
  0x4f   : > { %s817_s18 = scalar_lea.hbm %s1253_s2, 256  ;;  %p818_p12 = scmp.lt.u32.totalorder %s1112_s19, %s1253_s2 }
  0x50   : > { %p815_p6 = pnand %p813_p2, %p784_p1  ;;  %p819_p13 = scmp.lt.u32.totalorder %s817_s18, %s812_s27 }
  0x51   : > { %p821_p3 = scmp.lt.u32.totalorder %s812_s27, %s1112_s19 }
  0x52   : > { %p816_p7 = pneg %p815_p6  ;;  %p820_p8 = por %p819_p13, %p818_p12 }
  0x54   : > { %p822_p9 = por %p821_p3, %p820_p8 }
  0x56   : > { %p823_p4 = pnand %p822_p9, %p816_p7 }
  0x58   : > { %826 = shalt.err (!%p823_p4)
}
  0x59   : > { %s827_s15 = scalar_lea.vmem %s282_s10, 128  ;;  %s936_s20 = smov [#allocation7]  }
  0x5a   : > { %p828_p5 = scmp.ne.s32.totalorder %s282_s10, %s827_s15  ;;  %s832_s8 = sshll.u32 %s936_s20, 4  ;;  %s833_s8 = int_to_ptr.vmem [resolvable:$false] %s832_s8 }
  0x5b   : > { %s834_s21 = scalar_lea.vmem %s833_s8, 256  ;;  %p835_p6 = scmp.lt.s32.totalorder %s282_s10, %s833_s8 }
  0x5c   : > { %p830_p0 = pnand %p828_p5, %p784_p1  ;;  %p836_p10 = scmp.lt.s32.totalorder %s834_s21, %s827_s15 }
  0x5e   : > { %p831_p2 = pneg %p830_p0  ;;  %p837_p12 = por %p836_p10, %p835_p6 }
  0x60   : > { %p838_p13 = pnand %p837_p12, %p831_p2 }
  0x62   : > { %841 = shalt.err (!%p838_p13)
}
  0x63   : > { %704 = dma.hbm_to_vmem [thread:$0]  (!%p1105_p11), %s1112_s19, 128, %s282_s10, %s268_s14  }
  0x64   : > { %p1284_p7 = scmp.ne.s32.totalorder %s1275_s9, 0 }
  0x65   : > { %p1285_p8 = scmp.ne.s32.totalorder (!%p1284_p7), %s1270_s29, 0 }
  0x66   : > { %303 = sbr.rel (%p1284_p7) target bundleno = 395 (0x18b), region = 44 }
  0x6d   : > { %895 = dma.done.wait (%p1285_p8), [#allocation5], 16  }
  0x6e   : > { %897 = vsyncadd (%p1285_p8), [#allocation5], 4294967280  ;;  %s1169_s1 = sand.u32 1, %s916_s22   ;;  %p1286_p10 = scmp.ne.s32.totalorder %s1271_s30, 0 }
  0x6f   : > { %s1172_s11 = sshll.u32 %s1169_s1, 3  ;;  %s310_s28 = scalar_lea.sflag [#allocation3], %s1169_s1 }
  0x70   : > { %s313_s19 = scalar_lea.vmem [#allocation6], %s1172_s11 }
  0x71   : > { %899 = dma.done.wait (%p1286_p10), %s310_s28, 128  }
  0x72   : > { %901 = vsyncadd (%p1286_p10), %s310_s28, 4294967168  ;;  %s319_s29 = scalar_lea.sflag [#allocation8], %s1169_s1  ;;  %s322_s9 = scalar_lea.vmem [#allocation7], %s1172_s11 }
  0x73   : > { %903 = dma.done.wait (%p1286_p10), %s319_s29, 128  }
  0x74   : > { %905 = vsyncadd (%p1286_p10), %s319_s29, 4294967168 }
  0x75   : > { %327 = sfence }
  0x76   : > { %p369_p11 = scmp.lt.s32.totalorder %s924_s24, 1  ;;  %s379_s17 = sld [smem:[#allocation2]]  ;;  %v937_v0 = vmov 0.0   ;;  %v401_v1 = vld [vmem:[%s1256_s5] sm:$0xf]  ;;  %v938_v2 = vmov 0  }
  0x77   : > { %s669_s10 = sld [smem:[#allocation2 + $0x1]]  ;;  %s670_s14 = sld [smem:[#allocation2 + $0x2]]  ;;  %482 = vmatprep.mubr.f32.mxu0 %v937_v0  ;;  %764 = vset.pattern.permute.xlu0 %v938_v2  ;;  %v382_v3 = vld [vmem:[%s313_s19] sm:$0xff]  ;;  %v383_v4 = vld [vmem:[%s322_s9] sm:$0xff]  ;;  %vm413_vm0 = vcmask 1043456   ;;  %vm409_vm1 = vcmask 31744  }
  0x78   : > { %s370_s27 = scalar_select %p369_p11, %s924_s24, 1  ;;  %404 = vperm.xlu0 %764, %v401_v1   ;;  %v400_v20 = vld [vmem:[%s1255_s4] sm:$0xf] }
  0x79   : > { %s683_s21 = sshll.u32 %s924_s24, 7  ;;  %s365_s28 = scalar_lea.vmem [#allocation9], %s1172_s11 }
  0x7a   : > { %s682_s18 = sshll.u32 %s370_s27, 3  ;;  %s511_s19 = sshll.u32 %s365_s28, 4  ;;  %s1204_s19 = int_to_ptr.vmem [resolvable:$true] %s511_s19 }
  0x7b   : > { %s376_s15 = scalar_lea.vmem %s1254_s3, %s682_s18  ;;  %p1287_p3 = scmp.ne.s32.totalorder %s1272_s7, 0 }
  0x7c   : > { %v384_v5 = vld [vmem:[%s376_s15] sm:$0xff]  ;;  %v385_v6 = vstv %s379_s17  ;;  %s1202_s17 = scalar_lea.hbm %s1257_s6, %s683_s21  ;;  %s939_s24 = smov [#allocation9]  }
  0x7d   : > { %v386_v7 = vmul.f32 %v385_v6, %v382_v3  ;;  %v387_v8 = vstv %s669_s10  ;;  %v390_v9 = vstv %s670_s14  ;;  %s495_s10 = scalar_lea.sflag [#allocation4], %s1169_s1  ;;  %s842_s14 = scalar_lea.vmem %s1204_s19, 128 }
  0x7e   : > { %v388_v10 = vmul.f32 %v387_v8, %v383_v4  ;;  %v391_v11 = vmul.f32 %v390_v9, %v384_v5  ;;  %p843_p1 = scmp.ne.s32.totalorder %s1204_s19, %s842_s14  ;;  %s846_s11 = sshll.u32 %s939_s24, 4  ;;  %s847_s11 = int_to_ptr.vmem [resolvable:$false] %s846_s11 }
  0x7f   : > { %s848_s27 = scalar_lea.vmem %s847_s11, 256  ;;  %p849_p5 = scmp.lt.s32.totalorder %s1204_s19, %s847_s11 }
  0x80   : > { %v389_v12 = vadd.f32 %v388_v10, %v386_v7  ;;  %p844_p9 = pnand %p843_p1, %p1287_p3  ;;  %p850_p0 = scmp.lt.s32.totalorder %s848_s27, %s842_s14 }
  0x82   : > { %v392_v13 = vadd.f32 %v391_v11, %v389_v12  ;;  %p845_p4 = pneg %p844_p9  ;;  %p851_p2 = por %p850_p0, %p849_p5 }
  0x84   : > { %v671_v14 = vmul.f32 -1.442695, %v392_v13  ;;  %p852_p6 = pnand %p851_p2, %p845_p4 }
  0x86   : > { %765 = vpow2.f32 %v671_v14 }
  0x90   : > { %v766_v15 = vpop.eup %765 }
  0x91   : > { %v396_v16 = vadd.f32 1.0, %v766_v15 }
  0x93   : > { %767 = vrcp.f32 %v396_v16 }
  0x9d   : > { %v768_v17 = vpop.eup %767 }
  0x9e   : > { %v399_v18 = vmul.f32 %v768_v17, %v392_v13 }
  0xa0   : > { %v408_v19 = vcombine.high %v399_v18, %v399_v18 }
  0xa2   : > { %672 = vmatprep.subr.msk.mxu0 %vm413_vm0, %v408_v19 }
  0xa3   : > { %673 = vmatpush1.msk.msra.mxu0 %vm413_vm0, %v399_v18 }
  0xa4   : > { %674 = vmatmul.mubr.msk.f32.vlgmr.msra.gmra.mrb[0].mxu0 %vm409_vm1, %v400_v20 }
  0xf7   : > { %v405_v21 = vpop.permute.xlu0 %404 }
 0x177   : > { %v484_v22 = vpop.f32.mrb[0].mxu0 }
 0x178   : > { %v485_v23 = vadd.f32 %v484_v22, %v405_v21  ;;  %v486_v24 = vpop.f32.mrb[1].mxu0 }
 0x179   : > { %v487_v25 = vadd.f32 %v486_v24, %v405_v21 }
 0x17b   : > { %v491_v26 = vcombine.low %v485_v23, %v487_v25 }
 0x17d   : > { %493 = vst [vmem:[%s365_s28] sm:$0xff] %v491_v26 }
 0x17e   : > { %855 = shalt.err (!%p852_p6)
}
 0x17f   : > { %s856_s1 = scalar_lea.hbm %s1202_s17, 128  ;;  %s860_s18 = scalar_lea.hbm %s1257_s6, 256 }
 0x180   : > { %p857_p12 = scmp.ne.s32.totalorder %s1202_s17, %s856_s1  ;;  %p861_p8 = scmp.lt.u32.totalorder %s1202_s17, %s1257_s6 }
 0x181   : > { %p862_p10 = scmp.lt.u32.totalorder %s860_s18, %s856_s1  ;;  %p864_p1 = scmp.lt.u32.totalorder %s856_s1, %s1202_s17 }
 0x182   : > { %p858_p13 = pnand %p857_p12, %p1287_p3 }
 0x183   : > { %p863_p11 = por %p862_p10, %p861_p8 }
 0x184   : > { %p859_p7 = pneg %p858_p13 }
 0x185   : > { %p865_p9 = por %p864_p1, %p863_p11 }
 0x187   : > { %p866_p4 = pnand %p865_p9, %p859_p7 }
 0x189   : > { %869 = shalt.err (!%p866_p4)
}
 0x18a   : > { %692 = dma.vmem_to_hbm [thread:$0]  (%p1287_p3), %s1204_s19, 128, %s1202_s17, %s495_s10  }
 0x18b PF: > { %s1288_s15 = sld [smem:[#allocation14_spill]]  ;;  %s1289_s20 = sld [smem:[#allocation15_spill]] }
 0x18c   : > { %p1291_p0 = scmp.ge.s32.totalorder %s932_s26, 2 }
 0x191   : > { %s523_s8 = sand.u32 1, %s1288_s15   ;;  %p1290_p5 = scmp.ne.s32.totalorder %s1289_s20, 0 }
 0x192   : > { %s524_s21 = scalar_lea.sflag [#allocation4], %s523_s8 }
 0x193   : > { %p706_p2 = pnand %p1291_p0, %p1290_p5 }
 0x195   : > { %907 = dma.done.wait (!%p706_p2), %s524_s21, 128  }
 0x196   : > { %909 = vsyncadd (!%p706_p2), %s524_s21, 4294967168  ;;  %s26_s26 = sadd.s32 1, %s932_s26   ;;  %s1292_s7 = sld [smem:[#allocation16_spill]] }
 0x197   : > { %p23_p6 = scmp.ge.s32.totalorder %s26_s26, 4   ;;  %s1293_s21 = smov %s916_s22 }
 0x198   : > { %s1294_s22 = smov %s920_s23  ;;  %s1295_s23 = smov %s1097_s13 }
 0x199   : > { %s1296_s24 = smov %s928_s25  ;;  %25 = sbr.rel (!%p23_p6) target bundleno = 12 (0xc), region = 110 }
 0x19c   : > { %s1297_s25 = smov %s1292_s7 }
 0x1a0   :  { %529 = vsyncpa [#allocation3], 1 }
 0x1a1   :  { %531 = vsyncpa [#allocation3 + $0x1], 1 }
 0x1a2   :  { %532 = vsyncpa [#allocation8], 1 }
 0x1a3   :  { %534 = vsyncpa [#allocation8 + $0x1], 1 }
 0x1a4   :  { %535 = vsyncpa [#allocation4], 1 }
 0x1a5   :  { %537 = vsyncpa [#allocation4 + $0x1], 1 }
 0x1a6   :  { %538 = vsyncpa [#allocation5], 1 }
 0x1a7   :  { %540 = vsyncpa [#allocation5 + $0x1], 1 }

</bundles_post_ra>
